<compile_context>
chip_gen: v7x
topology: tpu7x:2x2x1
jax: 0.10.0
libtpu: 0.0.40
codegen_flags: <defaults>
</compile_context>

<pallas_src>
import functools

import jax
import jax.numpy as jnp
from jax.experimental import pallas as pl
from jax.experimental.pallas import tpu as pltpu


def _round_up(n, m):
    return ((n + m - 1) // m) * m


def _cdiv(a, b):
    return (a + b - 1) // b


# Big enough that the ~0.35us per-grid-step overhead is amortized (measured tile
# sweeps: 256->63%, 512->85% of HBM roofline); small enough to fit v5e's scoped VMEM
# once the limit is bumped (see vmem_limit_bytes below).
_TB_MAX = 512
# Don't bother splitting the batch across >=2 grid steps below this much work/step.
_MIN_ROWS_PER_STEP = 64


def _choose_batch_tiling(batch):
    """Pick (TB, B_pad, n_steps): TB multiple of 8, >=2 steps for megacore when the
    batch is big enough, and B_pad = n_steps*TB as tight as possible (minimal pad)."""
    b8 = _round_up(max(batch, 1), 8)
    if b8 >= 2 * _MIN_ROWS_PER_STEP:
        n_steps = max(2, _cdiv(b8, _TB_MAX))      # >=2 so v7x's second TC isn't idle
    else:
        n_steps = 1
    tb = _round_up(_cdiv(b8, n_steps), 8)
    return tb, n_steps * tb, n_steps


def _mlp_softmax_kernel(x_ref, w1_ref, b1_ref, w2_ref, b2_ref, w3_ref, b3_ref, o_ref):
    # x arrives as f32 (half the wrapper traffic of a pre-cast pass); cast to bf16
    # here so the MXU sees bf16 inputs. Accumulation / bias / ReLU / softmax in f32.
    x = x_ref[...].astype(jnp.bfloat16)                                  # (TB, D) bf16
    h1 = jnp.dot(x, w1_ref[...], preferred_element_type=jnp.float32) + b1_ref[...]
    h1 = jnp.maximum(h1, 0.0)                                            # ReLU (f32)
    h2 = jnp.dot(h1.astype(jnp.bfloat16), w2_ref[...],
                 preferred_element_type=jnp.float32) + b2_ref[...]
    h2 = jnp.maximum(h2, 0.0)                                            # ReLU (f32)
    logits = jnp.dot(h2.astype(jnp.bfloat16), w3_ref[...],
                     preferred_element_type=jnp.float32) + b3_ref[...]
    # softmax over features; padded logit lanes carry -1e30 bias -> exp == 0 exactly.
    m = jnp.max(logits, axis=-1, keepdims=True)
    e = jnp.exp(logits - m)
    probs = e / jnp.sum(e, axis=-1, keepdims=True)   # exact normalization (f32)
    o_ref[...] = probs.astype(o_ref.dtype)


@functools.partial(jax.jit, static_argnames=("img_size", "out_size", "out_dtype"))
def lenet53_forward(x, kernel_params, *, img_size, out_size, out_dtype=jnp.bfloat16):
    """x: (B, 1, img_size, img_size) float32 NCHW. Returns (B, out_size) softmax probs."""
    w1, b1, w2, b2, w3, b3 = kernel_params          # padded: bf16 weights, f32 biases
    B = x.shape[0]
    D = img_size * img_size
    D_pad, H1 = w1.shape
    H2 = w2.shape[1]
    OUT_pad = w3.shape[1]

    # Flatten like torch .view(B, -1); keep f32 (cast to bf16 happens in-kernel).
    x_flat = x.reshape(B, D)

    TB, B_pad, n_steps = _choose_batch_tiling(B)
    if (B_pad != B) or (D_pad != D):
        # Zero rows are sliced off afterwards; zero feature columns hit zero-padded
        # weight rows, so they contribute nothing. No-op for already-aligned shapes.
        x_flat = jnp.pad(x_flat, ((0, B_pad - B), (0, D_pad - D)))

    grid = (n_steps,)

    out_bytes = jnp.dtype(out_dtype).itemsize
    flops = 2 * B_pad * (D_pad * H1 + H1 * H2 + H2 * OUT_pad)
    bytes_accessed = (
        B_pad * D_pad * 4                              # x (f32, streamed)
        + (D_pad * H1 + H1 * H2 + H2 * OUT_pad) * 2    # weights (bf16, resident)
        + (H1 + H2 + OUT_pad) * 4                      # biases (f32)
        + B_pad * OUT_pad * out_bytes                  # output
    )

    resident = dict(pipeline_mode=pl.Buffered(1))      # grid-invariant -> 1 buffer

    out = pl.pallas_call(
        _mlp_softmax_kernel,
        out_shape=jax.ShapeDtypeStruct((B_pad, OUT_pad), out_dtype),
        grid=grid,
        in_specs=[
            pl.BlockSpec((TB, D_pad), lambda i: (i, 0)),     # x tile streams over batch
            pl.BlockSpec((D_pad, H1), lambda i: (0, 0), **resident),
            pl.BlockSpec((1, H1), lambda i: (0, 0), **resident),
            pl.BlockSpec((H1, H2), lambda i: (0, 0), **resident),
            pl.BlockSpec((1, H2), lambda i: (0, 0), **resident),
            pl.BlockSpec((H2, OUT_pad), lambda i: (0, 0), **resident),
            pl.BlockSpec((1, OUT_pad), lambda i: (0, 0), **resident),
        ],
        out_specs=pl.BlockSpec((TB, OUT_pad), lambda i: (i, 0)),
        compiler_params=pltpu.CompilerParams(
            dimension_semantics=("parallel",),
            vmem_limit_bytes=48 * 1024 * 1024,   # above v5e's 16 MiB scoped default,
        ),                                       # below v7x's 64 MiB physical VMEM
        cost_estimate=pl.CostEstimate(
            flops=flops,
            transcendentals=B_pad * OUT_pad,
            bytes_accessed=bytes_accessed,
        ),
    )(x_flat, w1, b1, w2, b2, w3, b3)

    # Drop batch padding and the -inf-logit output lanes (their probs are exactly 0).
    return out[:B, :out_size]


def init_params(key, img_size, out_size):
    """Logical f32 params mimicking torch.nn.Linear default init (U[-1/sqrt(fan_in), ...])."""
    d_in = img_size * img_size
    dims = [(d_in, 500), (500, 300), (300, out_size)]
    params = []
    for fan_in, fan_out in dims:
        key, kw, kb = jax.random.split(key, 3)
        bound = 1.0 / (fan_in ** 0.5)
        w = jax.random.uniform(kw, (fan_in, fan_out), jnp.float32, -bound, bound)
        b = jax.random.uniform(kb, (1, fan_out), jnp.float32, -bound, bound)
        params += [w, b]
    return tuple(params)


def pad_params(params, img_size, out_size):
    """One-time padding to lane-aligned shapes + bf16 weight cast for the kernel.

    Zero-padded hidden units are killed by ReLU; padded output logits get a -1e30
    bias so they contribute exp(.) == 0 to the softmax denominator. Biases stay f32
    (so -1e30 never overflows and accumulation stays f32).
    """
    w1, b1, w2, b2, w3, b3 = params
    d_in = img_size * img_size
    d_pad = _round_up(d_in, 128)
    h1_pad = _round_up(w1.shape[1], 128)            # 500 -> 512
    h2_pad = _round_up(w2.shape[1], 128)            # 300 -> 384
    out_pad = _round_up(max(out_size, 128), 128)    # e.g. 10 -> 128

    def pad2(a, rows, cols, fill=0.0):
        return jnp.pad(a, ((0, rows - a.shape[0]), (0, cols - a.shape[1])),
                       constant_values=fill)

    w1p = pad2(w1, d_pad, h1_pad).astype(jnp.bfloat16)
    b1p = pad2(b1, 1, h1_pad)                                   # f32, zero pad
    w2p = pad2(w2, h1_pad, h2_pad).astype(jnp.bfloat16)
    b2p = pad2(b2, 1, h2_pad)                                   # f32, zero pad
    w3p = pad2(w3, h2_pad, out_pad).astype(jnp.bfloat16)
    b3p = pad2(b3, 1, out_pad, fill=-1e30)                      # pad logits -> -inf
    return (w1p, b1p, w2p, b2p, w3p, b3p)


def reference_forward(x, params):
    """Pure-JAX f32 reference matching the PyTorch module."""
    w1, b1, w2, b2, w3, b3 = params
    xf = x.reshape(x.shape[0], -1)
    h1 = jnp.maximum(xf @ w1 + b1, 0.0)
    h2 = jnp.maximum(h1 @ w2 + b2, 0.0)
    logits = h2 @ w3 + b3
    return jax.nn.softmax(logits, axis=-1)


if __name__ == "__main__":
    IMG = 16
    OUT = 10
    B = 2

    key = jax.random.PRNGKey(0)
    key, kx = jax.random.split(key)
    x = jax.random.normal(kx, (B, 1, IMG, IMG), jnp.float32)    # NCHW like PyTorch

    logical_params = init_params(key, IMG, OUT)
    kernel_params = pad_params(logical_params, IMG, OUT)

    y = lenet53_forward(x, kernel_params, img_size=IMG, out_size=OUT)
    y = jax.block_until_ready(y)

    # Sanity: shape, rows sum to ~1, and match f32 reference within bf16-matmul +
    # bf16-output-rounding tolerance.
    y_ref = reference_forward(x, logical_params)
    y_f32 = y.astype(jnp.float32)
    assert y.shape == (B, OUT)
    assert bool(jnp.allclose(jnp.sum(y_f32, axis=-1), 1.0, atol=1e-2))
    assert bool(jnp.allclose(y_f32, y_ref, atol=2.5e-2))
    print("KERNEL_OK")
</pallas_src>

<mosaic_0001>
module attributes {stable_mosaic.version = 11 : i64} {
  func.func @_mlp_softmax_kernel(%arg0: i32, %arg1: memref<8x256xf32, #tpu.memory_space<vmem>>, %arg2: memref<256x512xbf16, #tpu.memory_space<vmem>>, %arg3: memref<1x512xf32, #tpu.memory_space<vmem>>, %arg4: memref<512x384xbf16, #tpu.memory_space<vmem>>, %arg5: memref<1x384xf32, #tpu.memory_space<vmem>>, %arg6: memref<384x128xbf16, #tpu.memory_space<vmem>>, %arg7: memref<1x128xf32, #tpu.memory_space<vmem>>, %arg8: memref<8x128xbf16, #tpu.memory_space<vmem>>) attributes {dimension_semantics = [#tpu.dimension_semantics<parallel>], iteration_bounds = array<i64: 1>, scalar_prefetch = 0 : i64, scratch_operands = 0 : i64, tpu.core_type = #tpu.core_type<tc>, window_params = [{transform_indices = @transform_0, window_bounds = array<i64: 8, 256>}, {pipeline_mode = #tpu.pipeline_mode<synchronous>, transform_indices = @transform_1, window_bounds = array<i64: 256, 512>}, {pipeline_mode = #tpu.pipeline_mode<synchronous>, transform_indices = @transform_2, window_bounds = array<i64: 1, 512>}, {pipeline_mode = #tpu.pipeline_mode<synchronous>, transform_indices = @transform_3, window_bounds = array<i64: 512, 384>}, {pipeline_mode = #tpu.pipeline_mode<synchronous>, transform_indices = @transform_4, window_bounds = array<i64: 1, 384>}, {pipeline_mode = #tpu.pipeline_mode<synchronous>, transform_indices = @transform_5, window_bounds = array<i64: 384, 128>}, {pipeline_mode = #tpu.pipeline_mode<synchronous>, transform_indices = @transform_6, window_bounds = array<i64: 1, 128>}, {transform_indices = @transform_7, window_bounds = array<i64: 8, 128>}]} {
    %c0 = arith.constant 0 : index
    %c0_0 = arith.constant 0 : index
    %0 = vector.load %arg1[%c0, %c0_0] : memref<8x256xf32, #tpu.memory_space<vmem>>, vector<8x256xf32>
    %1 = arith.truncf %0 : vector<8x256xf32> to vector<8x256xbf16>
    %c0_1 = arith.constant 0 : index
    %c0_2 = arith.constant 0 : index
    %2 = vector.load %arg2[%c0_1, %c0_2] : memref<256x512xbf16, #tpu.memory_space<vmem>>, vector<256x512xbf16>
    %cst = arith.constant dense<0.000000e+00> : vector<8x512xf32>
    %3 = tpu.matmul %1, %2, %cst {dimension_numbers = #tpu.dot_dimension_numbers<[1], [0], [0], [1], [0, 0, 1, 1], [], []>} : vector<8x256xbf16>, vector<256x512xbf16>, vector<8x512xf32> -> vector<8x512xf32>
    %c0_3 = arith.constant 0 : index
    %c0_4 = arith.constant 0 : index
    %4 = vector.load %arg3[%c0_3, %c0_4] : memref<1x512xf32, #tpu.memory_space<vmem>>, vector<1x512xf32>
    %5 = vector.broadcast %4 : vector<1x512xf32> to vector<8x512xf32>
    %6 = arith.addf %3, %5 : vector<8x512xf32>
    %cst_5 = arith.constant 0.000000e+00 : f32
    %7 = vector.broadcast %cst_5 : f32 to vector<8x512xf32>
    %8 = arith.maximumf %6, %7 : vector<8x512xf32>
    %9 = arith.truncf %8 : vector<8x512xf32> to vector<8x512xbf16>
    %c0_6 = arith.constant 0 : index
    %c0_7 = arith.constant 0 : index
    %10 = vector.load %arg4[%c0_6, %c0_7] : memref<512x384xbf16, #tpu.memory_space<vmem>>, vector<512x384xbf16>
    %cst_8 = arith.constant dense<0.000000e+00> : vector<8x384xf32>
    %11 = tpu.matmul %9, %10, %cst_8 {dimension_numbers = #tpu.dot_dimension_numbers<[1], [0], [0], [1], [0, 0, 1, 1], [], []>} : vector<8x512xbf16>, vector<512x384xbf16>, vector<8x384xf32> -> vector<8x384xf32>
    %c0_9 = arith.constant 0 : index
    %c0_10 = arith.constant 0 : index
    %12 = vector.load %arg5[%c0_9, %c0_10] : memref<1x384xf32, #tpu.memory_space<vmem>>, vector<1x384xf32>
    %13 = vector.broadcast %12 : vector<1x384xf32> to vector<8x384xf32>
    %14 = arith.addf %11, %13 : vector<8x384xf32>
    %cst_11 = arith.constant 0.000000e+00 : f32
    %15 = vector.broadcast %cst_11 : f32 to vector<8x384xf32>
    %16 = arith.maximumf %14, %15 : vector<8x384xf32>
    %17 = arith.truncf %16 : vector<8x384xf32> to vector<8x384xbf16>
    %c0_12 = arith.constant 0 : index
    %c0_13 = arith.constant 0 : index
    %18 = vector.load %arg6[%c0_12, %c0_13] : memref<384x128xbf16, #tpu.memory_space<vmem>>, vector<384x128xbf16>
    %cst_14 = arith.constant dense<0.000000e+00> : vector<8x128xf32>
    %19 = tpu.matmul %17, %18, %cst_14 {dimension_numbers = #tpu.dot_dimension_numbers<[1], [0], [0], [1], [0, 0, 1, 1], [], []>} : vector<8x384xbf16>, vector<384x128xbf16>, vector<8x128xf32> -> vector<8x128xf32>
    %c0_15 = arith.constant 0 : index
    %c0_16 = arith.constant 0 : index
    %20 = vector.load %arg7[%c0_15, %c0_16] : memref<1x128xf32, #tpu.memory_space<vmem>>, vector<1x128xf32>
    %21 = vector.broadcast %20 : vector<1x128xf32> to vector<8x128xf32>
    %22 = arith.addf %19, %21 : vector<8x128xf32>
    %cst_17 = arith.constant dense<0xFF800000> : vector<8xf32>
    %23 = vector.multi_reduction <maximumf>, %22, %cst_17 [1] : vector<8x128xf32> to vector<8xf32>
    %24 = vector.shape_cast %23 : vector<8xf32> to vector<8x1xf32>
    %25 = vector.broadcast %24 : vector<8x1xf32> to vector<8x128xf32>
    %26 = arith.subf %22, %25 : vector<8x128xf32>
    %27 = math.exp %26 : vector<8x128xf32>
    %cst_18 = arith.constant dense<0.000000e+00> : vector<8xf32>
    %28 = vector.multi_reduction <add>, %27, %cst_18 [1] : vector<8x128xf32> to vector<8xf32>
    %29 = vector.shape_cast %28 : vector<8xf32> to vector<8x1xf32>
    %30 = vector.broadcast %29 : vector<8x1xf32> to vector<8x128xf32>
    %31 = arith.divf %27, %30 : vector<8x128xf32>
    %32 = arith.truncf %31 : vector<8x128xf32> to vector<8x128xbf16>
    %c0_19 = arith.constant 0 : index
    %c0_20 = arith.constant 0 : index
    %33 = vector.load %arg8[%c0_19, %c0_20] : memref<8x128xbf16, #tpu.memory_space<vmem>>, vector<8x128xbf16>
    tpu.vector_store %arg8[%c0_19, %c0_20], %32 {strides = array<i32>} : memref<8x128xbf16, #tpu.memory_space<vmem>>, vector<8x128xbf16>,
    return
  }
  func.func @transform_0(%arg0: i32) -> (i32, i32) {
    %c0_i32 = arith.constant 0 : i32
    %c0_i32_0 = arith.constant 0 : i32
    return %arg0, %c0_i32 : i32, i32
  }
  func.func @transform_1(%arg0: i32) -> (i32, i32) {
    %c0_i32 = arith.constant 0 : i32
    %c0_i32_0 = arith.constant 0 : i32
    %c0_i32_1 = arith.constant 0 : i32
    return %c0_i32, %c0_i32_0 : i32, i32
  }
  func.func @transform_2(%arg0: i32) -> (i32, i32) {
    %c0_i32 = arith.constant 0 : i32
    %c0_i32_0 = arith.constant 0 : i32
    %c0_i32_1 = arith.constant 0 : i32
    return %c0_i32, %c0_i32_0 : i32, i32
  }
  func.func @transform_3(%arg0: i32) -> (i32, i32) {
    %c0_i32 = arith.constant 0 : i32
    %c0_i32_0 = arith.constant 0 : i32
    %c0_i32_1 = arith.constant 0 : i32
    return %c0_i32, %c0_i32_0 : i32, i32
  }
  func.func @transform_4(%arg0: i32) -> (i32, i32) {
    %c0_i32 = arith.constant 0 : i32
    %c0_i32_0 = arith.constant 0 : i32
    %c0_i32_1 = arith.constant 0 : i32
    return %c0_i32, %c0_i32_0 : i32, i32
  }
  func.func @transform_5(%arg0: i32) -> (i32, i32) {
    %c0_i32 = arith.constant 0 : i32
    %c0_i32_0 = arith.constant 0 : i32
    %c0_i32_1 = arith.constant 0 : i32
    return %c0_i32, %c0_i32_0 : i32, i32
  }
  func.func @transform_6(%arg0: i32) -> (i32, i32) {
    %c0_i32 = arith.constant 0 : i32
    %c0_i32_0 = arith.constant 0 : i32
    %c0_i32_1 = arith.constant 0 : i32
    return %c0_i32, %c0_i32_0 : i32, i32
  }
  func.func @transform_7(%arg0: i32) -> (i32, i32) {
    %c0_i32 = arith.constant 0 : i32
    %c0_i32_0 = arith.constant 0 : i32
    return %arg0, %c0_i32 : i32, i32
  }
}

</mosaic_0001>

<bundles_post_ra>
// kernel: lenet53_forward.1
= control target key start
LH: loop header
LB: loop body
LE: loop exit
PB: predicated region body
PF: predicated region fallthrough
CT: control target
= control target key end

     0   :  { %12 = vsyncpa [#allocation3], 0  ;;  %s2437_s0 = inlined_call_operand.vmem [shape: f32[8,256], index: 0, kind: input, shape index: {}]   ;;  %s2438_s1 = inlined_call_operand.hbm [shape: bf16[256,512], index: 1, kind: input, shape index: {}]   ;;  %s2439_s2 = inlined_call_operand.vmem [shape: f32[1,512], index: 2, kind: input, shape index: {}]   ;;  %s2440_s3 = inlined_call_operand.hbm [shape: bf16[512,384], index: 3, kind: input, shape index: {}]   ;;  %s2441_s4 = inlined_call_operand.vmem [shape: f32[1,384], index: 4, kind: input, shape index: {}]   ;;  %s2442_s5 = inlined_call_operand.hbm [shape: bf16[384,128], index: 5, kind: input, shape index: {}]   ;;  %s2443_s6 = inlined_call_operand.vmem [shape: f32[1,128], index: 6, kind: input, shape index: {}]   ;;  %s2444_s7 = inlined_call_operand.vmem [shape: bf16[8,128], index: 7, kind: output, shape index: {}]  }
   0x1   :  { %13 = vsyncpa [#allocation5], 0  ;;  %s2308_s24 = smov [#allocation4]   ;;  %s2238_s28 = scalar_lea.hbm %s2440_s3, 12288 }
   0x2   :  { %s35_s25 = sshll.u32 %s2308_s24, 4  ;;  %p2239_p0 = scmp.ne.s32.totalorder %s2440_s3, %s2238_s28  ;;  %s36_s25 = int_to_ptr.vmem [resolvable:$true] %s35_s25 }
   0x3   :  { %p2242_p1 = scmp.lt.u32.totalorder %s2238_s28, %s2440_s3 }
   0x5   :  { %p2244_p2 = pnand %p2242_p1, %p2239_p0 }
   0x7   :  { %2247 = shalt.err (!%p2244_p2)
}
   0x8   :  { %s2248_s10 = scalar_lea.vmem %s36_s25, 12288  ;;  %p2253_p4 = scmp.lt.s32.totalorder %s36_s25, %s36_s25 }
   0x9   :  { %p2249_p3 = scmp.ne.s32.totalorder %s36_s25, %s2248_s10  ;;  %p2254_p5 = scmp.lt.s32.totalorder %s2248_s10, %s2248_s10 }
   0xb   :  { %p2255_p6 = por %p2254_p5, %p2253_p4 }
   0xd   :  { %p2256_p7 = pnand %p2255_p6, %p2249_p3 }
   0xf   :  { %2259 = shalt.err (!%p2256_p7)
}
  0x10   :  { %s2309_s11 = smov 192   ;;  %s2310_s12 = smov 12  }
  0x11   :  { %41 = dma.hbm_to_vmem [thread:$0]  %s2440_s3, 12288, %s36_s25, [#allocation5], %s2309_s11, %s2309_s11, %s2310_s12  }
  0x12   :  { %s2311_s15 = smov [#allocation2]   ;;  %s2260_s19 = scalar_lea.hbm %s2438_s1, 8192 }
  0x13   :  { %s21_s16 = sshll.u32 %s2311_s15, 4  ;;  %p2261_p8 = scmp.ne.s32.totalorder %s2438_s1, %s2260_s19  ;;  %s22_s16 = int_to_ptr.vmem [resolvable:$true] %s21_s16 }
  0x14   :  { %p2264_p9 = scmp.lt.u32.totalorder %s2260_s19, %s2438_s1 }
  0x16   :  { %p2266_p10 = pnand %p2264_p9, %p2261_p8 }
  0x18   :  { %2269 = shalt.err (!%p2266_p10)
}
  0x19   :  { %s2270_s24 = scalar_lea.vmem %s22_s16, 8192  ;;  %p2275_p12 = scmp.lt.s32.totalorder %s22_s16, %s22_s16 }
  0x1a   :  { %p2271_p11 = scmp.ne.s32.totalorder %s22_s16, %s2270_s24  ;;  %p2276_p13 = scmp.lt.s32.totalorder %s2270_s24, %s2270_s24 }
  0x1c   :  { %p2277_p0 = por %p2276_p13, %p2275_p12 }
  0x1e   :  { %p2278_p1 = pnand %p2277_p0, %p2271_p11 }
  0x20   :  { %2281 = shalt.err (!%p2278_p1)
}
  0x21   :  { %s2312_s3 = smov 256   ;;  %s2313_s25 = smov 16  }
  0x22   :  { %27 = dma.hbm_to_vmem [thread:$0]  %s2438_s1, 8192, %s22_s16, [#allocation3], %s2312_s3, %s2312_s3, %s2313_s25  }
  0x23   :  { %s2314_s28 = smov [#allocation6]   ;;  %s2282_s9 = scalar_lea.hbm %s2442_s5, 3072 }
  0x24   :  { %s49_s29 = sshll.u32 %s2314_s28, 4  ;;  %p2283_p2 = scmp.ne.s32.totalorder %s2442_s5, %s2282_s9  ;;  %s50_s29 = int_to_ptr.vmem [resolvable:$true] %s49_s29 }
  0x25   :  { %p2286_p3 = scmp.lt.u32.totalorder %s2282_s9, %s2442_s5 }
  0x27   :  { %p2288_p4 = pnand %p2286_p3, %p2283_p2 }
  0x29   :  { %2291 = shalt.err (!%p2288_p4)
}
  0x2a   :  { %s2292_s14 = scalar_lea.vmem %s50_s29, 3072  ;;  %p2297_p6 = scmp.lt.s32.totalorder %s50_s29, %s50_s29 }
  0x2b   :  { %p2293_p5 = scmp.ne.s32.totalorder %s50_s29, %s2292_s14  ;;  %p2298_p7 = scmp.lt.s32.totalorder %s2292_s14, %s2292_s14 }
  0x2d   :  { %p2299_p8 = por %p2298_p7, %p2297_p6 }
  0x2f   :  { %p2300_p9 = pnand %p2299_p8, %p2293_p5 }
  0x31   :  { %2303 = shalt.err (!%p2300_p9)
}
  0x32   :  { %s2315_s1 = smov 64   ;;  %s2316_s15 = smov 4  }
  0x33   :  { %55 = dma.hbm_to_vmem [thread:$0]  %s2442_s5, 3072, %s50_s29, [#allocation5], %s2315_s1, %s2315_s1, %s2316_s15  }
  0x34   :  { %2304 = dma.done.wait [#allocation3], 8192  }
  0x35   :  { %2305 = vsyncadd [#allocation3], 4294959104 }
  0x36   :  { %2306 = dma.done.wait [#allocation5], 15360  }
  0x37   :  { %2307 = vsyncadd [#allocation5], 4294951936  ;;  %v1986_v0 = vld [vmem:[#allocation2 + $0x4] ss:$16 sps:$4 sm:$0xff]   ;;  %v1988_v1 = vld [vmem:[#allocation2] ss:$16 sps:$4 sm:$0xff]  }
  0x38   :  { %478 = vmatprep.subr.bf16.mxu0 %v1986_v0  ;;  %v1989_v2 = vld [vmem:[#allocation2 + $0x24] ss:$16 sps:$4 sm:$0xff]   ;;  %v1991_v3 = vld [vmem:[#allocation2 + $0x20] ss:$16 sps:$4 sm:$0xff]   ;;  %v2010_v8 = vld [vmem:[#allocation2 + $0xc] ss:$16 sps:$4 sm:$0xff]  }
  0x39   :  { %479 = vmatpush1.bf16.msra.mxu0 %v1988_v1  ;;  %v1992_v4 = vld [vmem:[#allocation2 + $0x44] ss:$16 sps:$4 sm:$0xff]   ;;  %v1994_v5 = vld [vmem:[#allocation2 + $0x40] ss:$16 sps:$4 sm:$0xff]   ;;  %v2014_v10 = vld [vmem:[#allocation2 + $0x8] ss:$16 sps:$4 sm:$0xff]   ;;  %519 = vmatprep.subr.bf16.mxu1 %v2010_v8 }
  0x3a   :  { %480 = vmatprep.subr.bf16.mxu0 %v1989_v2  ;;  %v1995_v6 = vld [vmem:[#allocation2 + $0x64] ss:$16 sps:$4 sm:$0xff]   ;;  %v1997_v7 = vld [vmem:[#allocation2 + $0x60] ss:$16 sps:$4 sm:$0xff]   ;;  %520 = vmatpush1.bf16.msra.mxu1 %v2014_v10  ;;  %v2016_v11 = vld [vmem:[#allocation2 + $0x2c] ss:$16 sps:$4 sm:$0xff]  }
  0x3b   :  { %v1998_v9 = vld [vmem:[#allocation2 + $0x84] ss:$16 sps:$4 sm:$0xff]   ;;  %v2000_v12 = vld [vmem:[#allocation2 + $0x80] ss:$16 sps:$4 sm:$0xff]   ;;  %v2020_v14 = vld [vmem:[#allocation2 + $0x28] ss:$16 sps:$4 sm:$0xff]   ;;  %521 = vmatprep.subr.bf16.mxu1 %v2016_v11 }
  0x3c   :  { %v2001_v13 = vld [vmem:[#allocation2 + $0xa4] ss:$16 sps:$4 sm:$0xff]   ;;  %v2022_v15 = vld [vmem:[#allocation2 + $0x4c] ss:$16 sps:$4 sm:$0xff]   ;;  %v2003_v16 = vld [vmem:[#allocation2 + $0xa0] ss:$16 sps:$4 sm:$0xff]  }
  0x3d   :  { %481 = vmatpush1.bf16.msra.mxu0 %v1991_v3  ;;  %v2026_v17 = vld [vmem:[#allocation2 + $0x48] ss:$16 sps:$4 sm:$0xff]   ;;  %v2028_v18 = vld [vmem:[#allocation2 + $0x6c] ss:$16 sps:$4 sm:$0xff]   ;;  %v2004_v19 = vld [vmem:[#allocation2 + $0xc4] ss:$16 sps:$4 sm:$0xff]  }
  0x3e   :  { %482 = vmatprep.subr.bf16.mxu0 %v1992_v4  ;;  %522 = vmatpush1.bf16.msra.mxu1 %v2020_v14  ;;  %v2032_v20 = vld [vmem:[#allocation2 + $0x68] ss:$16 sps:$4 sm:$0xff]   ;;  %v2006_v21 = vld [vmem:[#allocation2 + $0xc0] ss:$16 sps:$4 sm:$0xff]   ;;  %v2034_v22 = vld [vmem:[#allocation2 + $0x8c] ss:$16 sps:$4 sm:$0xff]  }
  0x3f   :  { %523 = vmatprep.subr.bf16.mxu1 %v2022_v15  ;;  %v2007_v23 = vld [vmem:[#allocation2 + $0xe4] ss:$16 sps:$4 sm:$0xff]   ;;  %v2009_v24 = vld [vmem:[#allocation2 + $0xe0] ss:$16 sps:$4 sm:$0xff]   ;;  %v2038_v25 = vld [vmem:[#allocation2 + $0x88] ss:$16 sps:$4 sm:$0xff]  }
  0x40   :  { %v2040_v26 = vld [vmem:[#allocation2 + $0xac] ss:$16 sps:$4 sm:$0xff]   ;;  %v2012_v27 = vld [vmem:[#allocation2 + $0x104] ss:$16 sps:$4 sm:$0xff]   ;;  %v2044_v28 = vld [vmem:[#allocation2 + $0xa8] ss:$16 sps:$4 sm:$0xff]  }
  0x41   :  { %483 = vmatpush1.bf16.msra.mxu0 %v1994_v5  ;;  %v2015_v29 = vld [vmem:[#allocation2 + $0x100] ss:$16 sps:$4 sm:$0xff]   ;;  %v2018_v30 = vld [vmem:[#allocation2 + $0x124] ss:$16 sps:$4 sm:$0xff]   ;;  %v2046_v31 = vld [vmem:[#allocation2 + $0xcc] ss:$16 sps:$4 sm:$0xff]  }
  0x42   :  { %484 = vmatprep.subr.bf16.mxu0 %v1995_v6  ;;  %524 = vmatpush1.bf16.msra.mxu1 %v2026_v17  ;;  %v69_v32 = vld [vmem:[%s2437_s0 + $0x8] sm:$0xff]  ;;  %v2021_v33 = vld [vmem:[#allocation2 + $0x120] ss:$16 sps:$4 sm:$0xff]   ;;  %v2024_v37 = vld [vmem:[#allocation2 + $0x144] ss:$16 sps:$4 sm:$0xff]   ;;  %vm2318_vm0 = vmmov 0  }
  0x43   :  { %525 = vmatprep.subr.bf16.mxu1 %v2028_v18  ;;  %v71_v34 = vpack.c.bf16 %v69_v32, %v69_v32  ;;  %v2050_v35 = vld [vmem:[#allocation2 + $0xc8] ss:$16 sps:$4 sm:$0xff]   ;;  %v2052_v36 = vld [vmem:[#allocation2 + $0xec] ss:$16 sps:$4 sm:$0xff]   ;;  %v2027_v38 = vld [vmem:[#allocation2 + $0x140] ss:$16 sps:$4 sm:$0xff]  }
  0x44   :  { %v2056_v39 = vld [vmem:[#allocation2 + $0xe8] ss:$16 sps:$4 sm:$0xff]   ;;  %v2058_v40 = vld [vmem:[#allocation2 + $0x10c] ss:$16 sps:$4 sm:$0xff]   ;;  %v2030_v41 = vld [vmem:[#allocation2 + $0x164] ss:$16 sps:$4 sm:$0xff]  }
  0x45   :  { %485 = vmatpush1.bf16.msra.mxu0 %v1997_v7  ;;  %510 = vmatprep.mubr.bf16.mxu0 %v71_v34  ;;  %v2033_v42 = vld [vmem:[#allocation2 + $0x160] ss:$16 sps:$4 sm:$0xff]   ;;  %v2060_v43 = vld [vmem:[#allocation2 + $0x108] ss:$16 sps:$4 sm:$0xff]   ;;  %v2061_v44 = vld [vmem:[#allocation2 + $0x12c] ss:$16 sps:$4 sm:$0xff]  }
  0x46   :  { %486 = vmatprep.subr.bf16.mxu0 %v1998_v9  ;;  %526 = vmatpush1.bf16.msra.mxu1 %v2032_v20  ;;  %v2036_v45 = vld [vmem:[#allocation2 + $0x184] ss:$16 sps:$4 sm:$0xff]   ;;  %v2039_v46 = vld [vmem:[#allocation2 + $0x180] ss:$16 sps:$4 sm:$0xff]   ;;  %v2063_v47 = vld [vmem:[#allocation2 + $0x128] ss:$16 sps:$4 sm:$0xff]  }
  0x47   :  { %527 = vmatprep.subr.bf16.mxu1 %v2034_v22  ;;  %551 = vmatprep.mubr.bf16.mxu1 %v71_v34  ;;  %v2064_v48 = vld [vmem:[#allocation2 + $0x14c] ss:$16 sps:$4 sm:$0xff]   ;;  %v2042_v49 = vld [vmem:[#allocation2 + $0x1a4] ss:$16 sps:$4 sm:$0xff]   ;;  %v2045_v50 = vld [vmem:[#allocation2 + $0x1a0] ss:$16 sps:$4 sm:$0xff]  }
  0x48   :  { %v2066_v51 = vld [vmem:[#allocation2 + $0x148] ss:$16 sps:$4 sm:$0xff]   ;;  %v2067_v52 = vld [vmem:[#allocation2 + $0x16c] ss:$16 sps:$4 sm:$0xff]   ;;  %v2048_v53 = vld [vmem:[#allocation2 + $0x1c4] ss:$16 sps:$4 sm:$0xff]  }
  0x49   :  { %487 = vmatpush1.bf16.msra.mxu0 %v2000_v12  ;;  %v2051_v54 = vld [vmem:[#allocation2 + $0x1c0] ss:$16 sps:$4 sm:$0xff]   ;;  %v2069_v55 = vld [vmem:[#allocation2 + $0x168] ss:$16 sps:$4 sm:$0xff]   ;;  %v2070_v56 = vld [vmem:[#allocation2 + $0x18c] ss:$16 sps:$4 sm:$0xff]  }
  0x4a   :  { %488 = vmatprep.subr.bf16.mxu0 %v2001_v13  ;;  %528 = vmatpush1.bf16.msra.mxu1 %v2038_v25  ;;  %v2054_v57 = vld [vmem:[#allocation2 + $0x1e4] ss:$16 sps:$4 sm:$0xff]   ;;  %v2057_v58 = vld [vmem:[#allocation2 + $0x1e0] ss:$16 sps:$4 sm:$0xff]   ;;  %v2072_v60 = vld [vmem:[#allocation2 + $0x188] ss:$16 sps:$4 sm:$0xff]  }
  0x4b   :  { %529 = vmatprep.subr.bf16.mxu1 %v2040_v26  ;;  %v68_v59 = vld [vmem:[%s2437_s0] sm:$0xff]  ;;  %v2073_v61 = vld [vmem:[#allocation2 + $0x1ac] ss:$16 sps:$4 sm:$0xff]   ;;  %v2075_v63 = vld [vmem:[#allocation2 + $0x1a8] ss:$16 sps:$4 sm:$0xff]  }
  0x4c   :  { %v2084_v62 = vld [vmem:[#allocation4 + $0x4] ss:$12 sps:$4 sm:$0xff]   ;;  %v70_v0 = vpack.c.bf16 %v68_v59, %v68_v59  ;;  %v2076_v1 = vld [vmem:[#allocation2 + $0x1cc] ss:$16 sps:$4 sm:$0xff]   ;;  %v2078_v4 = vld [vmem:[#allocation2 + $0x1c8] ss:$16 sps:$4 sm:$0xff]  }
  0x4d   :  { %489 = vmatpush1.bf16.msra.mxu0 %v2003_v16  ;;  %v2082_v2 = vld [vmem:[#allocation4] ss:$12 sps:$4 sm:$0xff]   ;;  %v2087_v3 = vld [vmem:[#allocation4 + $0x1c] ss:$12 sps:$4 sm:$0xff]   ;;  %v2085_v6 = vld [vmem:[#allocation4 + $0x18] ss:$12 sps:$4 sm:$0xff]  }
  0x4e   :  { %490 = vmatprep.subr.bf16.mxu0 %v2004_v19  ;;  %530 = vmatpush1.bf16.msra.mxu1 %v2044_v28  ;;  %v2079_v5 = vld [vmem:[#allocation2 + $0x1ec] ss:$16 sps:$4 sm:$0xff]   ;;  %v2090_v7 = vld [vmem:[#allocation4 + $0x34] ss:$12 sps:$4 sm:$0xff]   ;;  %v2081_v8 = vld [vmem:[#allocation2 + $0x1e8] ss:$16 sps:$4 sm:$0xff]  }
  0x4f   :  { %531 = vmatprep.subr.bf16.mxu1 %v2046_v31  ;;  %v2088_v9 = vld [vmem:[#allocation4 + $0x30] ss:$12 sps:$4 sm:$0xff]   ;;  %v2109_v10 = vld [vmem:[#allocation4 + $0xc8] ss:$12 sps:$4 sm:$0xff]   ;;  %v2093_v11 = vld [vmem:[#allocation4 + $0x4c] ss:$12 sps:$4 sm:$0xff]  }
  0x50   :  { %v2091_v12 = vld [vmem:[#allocation4 + $0x48] ss:$12 sps:$4 sm:$0xff]   ;;  %v2096_v14 = vld [vmem:[#allocation4 + $0x64] ss:$12 sps:$4 sm:$0xff]   ;;  %v2114_v15 = vld [vmem:[#allocation4 + $0xe0] ss:$12 sps:$4 sm:$0xff]  }
  0x51   :  { %491 = vmatpush1.bf16.msra.mxu0 %v2006_v21  ;;  %v2110_v13 = vld [vmem:[#allocation4 + $0x8] ss:$12 sps:$4 sm:$0xff]   ;;  %v2115_v16 = vld [vmem:[#allocation4 + $0x20] ss:$12 sps:$4 sm:$0xff]   ;;  %v2119_v18 = vld [vmem:[#allocation4 + $0xf8] ss:$12 sps:$4 sm:$0xff]  }
  0x52   :  { %492 = vmatprep.subr.bf16.mxu0 %v2007_v23  ;;  %532 = vmatpush1.bf16.msra.mxu1 %v2050_v35  ;;  %v2094_v17 = vld [vmem:[#allocation4 + $0x60] ss:$12 sps:$4 sm:$0xff]   ;;  %v2099_v19 = vld [vmem:[#allocation4 + $0x7c] ss:$12 sps:$4 sm:$0xff]   ;;  %v2120_v20 = vld [vmem:[#allocation4 + $0x38] ss:$12 sps:$4 sm:$0xff]  }
  0x53   :  { %533 = vmatprep.subr.bf16.mxu1 %v2052_v36  ;;  %v2097_v21 = vld [vmem:[#allocation4 + $0x78] ss:$12 sps:$4 sm:$0xff]   ;;  %v2124_v22 = vld [vmem:[#allocation4 + $0x110] ss:$12 sps:$4 sm:$0xff]   ;;  %v2102_v23 = vld [vmem:[#allocation4 + $0x94] ss:$12 sps:$4 sm:$0xff]  }
  0x54   :  { %v2100_v25 = vld [vmem:[#allocation4 + $0x90] ss:$12 sps:$4 sm:$0xff]   ;;  %v2129_v26 = vld [vmem:[#allocation4 + $0x128] ss:$12 sps:$4 sm:$0xff]   ;;  %v2135_v32 = vld [vmem:[#allocation4 + $0x80] ss:$12 sps:$4 sm:$0xff]  }
  0x55   :  { %493 = vmatpush1.bf16.msra.mxu0 %v2009_v24  ;;  %v2125_v24 = vld [vmem:[#allocation4 + $0x50] ss:$12 sps:$4 sm:$0xff]   ;;  %v2130_v28 = vld [vmem:[#allocation4 + $0x68] ss:$12 sps:$4 sm:$0xff]   ;;  %v2111_v35 = vld [vmem:[#allocation4 + $0xd8] ss:$12 sps:$4 sm:$0xff]  }
  0x56   :  { %494 = vmatprep.subr.bf16.mxu0 %v2012_v27  ;;  %534 = vmatpush1.bf16.msra.mxu1 %v2056_v39  ;;  %v2105_v27 = vld [vmem:[#allocation4 + $0xac] ss:$12 sps:$4 sm:$0xff]   ;;  %v2108_v31 = vld [vmem:[#allocation4 + $0xc4] ss:$12 sps:$4 sm:$0xff]   ;;  %v2113_v34 = vld [vmem:[#allocation4 + $0xdc] ss:$12 sps:$4 sm:$0xff]  }
  0x57   :  { %535 = vmatprep.subr.bf16.mxu1 %v2058_v40  ;;  %v2118_v36 = vld [vmem:[#allocation4 + $0xf4] ss:$12 sps:$4 sm:$0xff]   ;;  %v2128_v40 = vld [vmem:[#allocation4 + $0x124] ss:$12 sps:$4 sm:$0xff]  }
  0x58   :  { %v2121_v39 = vld [vmem:[#allocation4 + $0x108] ss:$12 sps:$4 sm:$0xff]  }
  0x59   :  { %495 = vmatpush1.bf16.msra.mxu0 %v2015_v29  ;;  %v2103_v29 = vld [vmem:[#allocation4 + $0xa8] ss:$12 sps:$4 sm:$0xff]  }
  0x5a   :  { %496 = vmatprep.subr.bf16.mxu0 %v2018_v30  ;;  %536 = vmatpush1.bf16.msra.mxu1 %v2060_v43  ;;  %v2134_v30 = vld [vmem:[#allocation4 + $0x140] ss:$12 sps:$4 sm:$0xff]   ;;  %v2131_v43 = vld [vmem:[#allocation4 + $0x138] ss:$12 sps:$4 sm:$0xff]  }
  0x5b   :  { %537 = vmatprep.subr.bf16.mxu1 %v2061_v44  ;;  %v2138_v44 = vld [vmem:[#allocation4 + $0x154] ss:$12 sps:$4 sm:$0xff]  }
  0x5d   :  { %497 = vmatpush1.bf16.msra.mxu0 %v2021_v33  ;;  %v2106_v33 = vld [vmem:[#allocation4 + $0xc0] ss:$12 sps:$4 sm:$0xff]  }
  0x5e   :  { %498 = vmatprep.subr.bf16.mxu0 %v2024_v37  ;;  %538 = vmatpush1.bf16.msra.mxu1 %v2063_v47  ;;  %v2116_v37 = vld [vmem:[#allocation4 + $0xf0] ss:$12 sps:$4 sm:$0xff]   ;;  %v2140_v47 = vld [vmem:[#allocation4 + $0x98] ss:$12 sps:$4 sm:$0xff]  }
  0x5f   :  { %539 = vmatprep.subr.bf16.mxu1 %v2064_v48  ;;  %v2143_v48 = vld [vmem:[#allocation4 + $0x16c] ss:$12 sps:$4 sm:$0xff]  }
  0x61   :  { %499 = vmatpush1.bf16.msra.mxu0 %v2027_v38  ;;  %v2123_v38 = vld [vmem:[#allocation4 + $0x10c] ss:$12 sps:$4 sm:$0xff]  }
  0x62   :  { %500 = vmatprep.subr.bf16.mxu0 %v2030_v41  ;;  %540 = vmatpush1.bf16.msra.mxu1 %v2066_v51  ;;  %v2126_v41 = vld [vmem:[#allocation4 + $0x120] ss:$12 sps:$4 sm:$0xff]   ;;  %v2145_v51 = vld [vmem:[#allocation4 + $0xb0] ss:$12 sps:$4 sm:$0xff]  }
  0x63   :  { %541 = vmatprep.subr.bf16.mxu1 %v2067_v52  ;;  %v2148_v52 = vld [vmem:[#allocation4 + $0x184] ss:$12 sps:$4 sm:$0xff]  }
  0x65   :  { %501 = vmatpush1.bf16.msra.mxu0 %v2033_v42  ;;  %v2133_v42 = vld [vmem:[#allocation4 + $0x13c] ss:$12 sps:$4 sm:$0xff]  }
  0x66   :  { %502 = vmatprep.subr.bf16.mxu0 %v2036_v45  ;;  %542 = vmatpush1.bf16.msra.mxu1 %v2069_v55  ;;  %v2139_v45 = vld [vmem:[#allocation4 + $0x158] ss:$12 sps:$4 sm:$0xff]  }
  0x67   :  { %543 = vmatprep.subr.bf16.mxu1 %v2070_v56 }
  0x69   :  { %503 = vmatpush1.bf16.msra.mxu0 %v2039_v46  ;;  %v2136_v46 = vld [vmem:[#allocation4 + $0x150] ss:$12 sps:$4 sm:$0xff]  }
  0x6a   :  { %504 = vmatprep.subr.bf16.mxu0 %v2042_v49  ;;  %544 = vmatpush1.bf16.msra.mxu1 %v2072_v60  ;;  %v2144_v49 = vld [vmem:[#allocation4 + $0x170] ss:$12 sps:$4 sm:$0xff]  }
  0x6b   :  { %545 = vmatprep.subr.bf16.mxu1 %v2073_v61 }
  0x6d   :  { %505 = vmatpush1.bf16.msra.mxu0 %v2045_v50  ;;  %v2141_v50 = vld [vmem:[#allocation4 + $0x168] ss:$12 sps:$4 sm:$0xff]  }
  0x6e   :  { %506 = vmatprep.subr.bf16.mxu0 %v2048_v53  ;;  %546 = vmatpush1.bf16.msra.mxu1 %v2075_v63  ;;  %v2149_v53 = vld [vmem:[#allocation4 + $0x248] ss:$12 sps:$4 sm:$0xff]  }
  0x6f   :  { %547 = vmatprep.subr.bf16.mxu1 %v2076_v1 }
  0x71   :  { %507 = vmatpush1.bf16.msra.mxu0 %v2051_v54  ;;  %v138_v54 = vlaneseq }
  0x72   :  { %508 = vmatprep.subr.bf16.mxu0 %v2054_v57  ;;  %548 = vmatpush1.bf16.msra.mxu1 %v2078_v4  ;;  %v2407_v57 = vld [vmem:[%s2439_s2] sm:$0xf] }
  0x73   :  { %549 = vmatprep.subr.bf16.mxu1 %v2079_v5  ;;  %v2401_v55 = vshrl.u32 %v138_v54, 7  ;;  %v2189_v54 = vld [vmem:[#allocation4 + $0x258] ss:$12 sps:$4 sm:$0xff]  }
  0x75   :  { %509 = vmatpush1.bf16.msra.mxu0 %v2057_v58  ;;  %v140_v56 = vsub.s32 0, %v2401_v55  ;;  %v144_v58 = vsub.s32 1, %v2401_v55  ;;  %v152_v5 = vsub.s32 3, %v2401_v55 }
  0x76   :  { %1225 = vmatprep.subr.bf16.mxu0 %v2084_v62  ;;  %550 = vmatpush1.bf16.msra.mxu1 %v2081_v8  ;;  %v2150_v8 = vld [vmem:[#allocation4 + $0x188] ss:$12 sps:$4 sm:$0xff]  }
  0x77   :  { %1874 = vmatprep.subr.bf16.mxu1 %v2109_v10  ;;  %v141_v59 = vrot.slane %v2407_v57, %v140_v56  ;;  %v145_v60 = vrot.slane %v2407_v57, %v144_v58  ;;  %v2153_v10 = vld [vmem:[#allocation4 + $0x19c] ss:$12 sps:$4 sm:$0xff]  }
  0x78   :  { %511 = vmatmul.mubr.bf16.vlgmr.msra.gmra.mrb[0].mxu0 %v70_v0 }
  0x79   :  { %1226 = vmatpush1.bf16.msra.mxu0 %v2082_v2  ;;  %552 = vmatmul.mubr.bf16.vlgmr.msra.gmra.mrb[0].mxu1 %v70_v0 }
  0x7a   :  { %1227 = vmatprep.subr.bf16.mxu0 %v2087_v3  ;;  %1875 = vmatpush3.bf16.msra.mxu1 %v2110_v13  ;;  %v2151_v13 = vld [vmem:[#allocation4 + $0x198] ss:$12 sps:$4 sm:$0xff]  }
  0x7b   :  { %1876 = vmatprep.subr.bf16.mxu1 %v2114_v15  ;;  %v2158_v15 = vld [vmem:[#allocation4 + $0x1b4] ss:$12 sps:$4 sm:$0xff]  }
  0x7d   :  { %1228 = vmatpush1.bf16.msra.mxu0 %v2085_v6 }
  0x7e   :  { %1229 = vmatprep.subr.bf16.mxu0 %v2090_v7  ;;  %1877 = vmatpush3.bf16.msra.mxu1 %v2115_v16  ;;  %v2146_v7 = vld [vmem:[#allocation4 + $0x180] ss:$12 sps:$4 sm:$0xff]   ;;  %v2159_v16 = vld [vmem:[#allocation4 + $0x278] ss:$12 sps:$4 sm:$0xff]  }
  0x7f   :  { %1878 = vmatprep.subr.bf16.mxu1 %v2119_v18 }
  0x81   :  { %1230 = vmatpush1.bf16.msra.mxu0 %v2088_v9 }
  0x82   :  { %1231 = vmatprep.subr.bf16.mxu0 %v2093_v11  ;;  %1879 = vmatpush3.bf16.msra.mxu1 %v2120_v20  ;;  %v2154_v11 = vld [vmem:[#allocation4 + $0x260] ss:$12 sps:$4 sm:$0xff]  }
  0x83   :  { %1880 = vmatprep.subr.bf16.mxu1 %v2124_v22  ;;  %v2160_v22 = vld [vmem:[#allocation4 + $0x1b8] ss:$12 sps:$4 sm:$0xff]  }
  0x85   :  { %1232 = vmatpush1.bf16.msra.mxu0 %v2091_v12  ;;  %v153_v12 = vrot.slane %v2407_v57, %v152_v5  ;;  %v2207_v5 = vld [vmem:[#allocation4 + $0x2e8] ss:$12 sps:$4 sm:$0xff]  }
  0x86   :  { %1233 = vmatprep.subr.bf16.mxu0 %v2096_v14  ;;  %1881 = vmatpush3.bf16.msra.mxu1 %v2125_v24  ;;  %v2155_v14 = vld [vmem:[#allocation4 + $0x1a0] ss:$12 sps:$4 sm:$0xff]  }
  0x87   :  { %1882 = vmatprep.subr.bf16.mxu1 %v2129_v26  ;;  %v2163_v24 = vld [vmem:[#allocation4 + $0x1cc] ss:$12 sps:$4 sm:$0xff]  }
  0x89   :  { %1234 = vmatpush1.bf16.msra.mxu0 %v2094_v17 }
  0x8a   :  { %1235 = vmatprep.subr.bf16.mxu0 %v2099_v19  ;;  %1883 = vmatpush3.bf16.msra.mxu1 %v2130_v28  ;;  %v2161_v28 = vld [vmem:[#allocation4 + $0x1c8] ss:$12 sps:$4 sm:$0xff]  }
  0x8b   :  { %1884 = vmatprep.subr.bf16.mxu1 %v2134_v30  ;;  %v2168_v30 = vld [vmem:[#allocation4 + $0x1e4] ss:$12 sps:$4 sm:$0xff]  }
  0x8d   :  { %1236 = vmatpush1.bf16.msra.mxu0 %v2097_v21  ;;  %v2156_v21 = vld [vmem:[#allocation4 + $0x1b0] ss:$12 sps:$4 sm:$0xff]  }
  0x8e   :  { %1237 = vmatprep.subr.bf16.mxu0 %v2102_v23  ;;  %1885 = vmatpush3.bf16.msra.mxu1 %v2135_v32  ;;  %v148_v32 = vsub.s32 2, %v2401_v55  ;;  %v2228_v55 = vld [vmem:[#allocation6 + $0x90] sm:$0xff]  }
  0x8f   :  { %1886 = vmatprep.subr.bf16.mxu1 %v2139_v45  ;;  %v2183_v45 = vld [vmem:[#allocation4 + $0x22c] ss:$12 sps:$4 sm:$0xff]  }
  0x91   :  { %1238 = vmatpush1.bf16.msra.mxu0 %v2100_v25  ;;  %v2164_v25 = vld [vmem:[#allocation4 + $0x290] ss:$12 sps:$4 sm:$0xff]  }
  0x92   :  { %1239 = vmatprep.subr.bf16.mxu0 %v2105_v27  ;;  %1887 = vmatpush3.bf16.msra.mxu1 %v2140_v47 }
  0x93   :  { %1888 = vmatprep.subr.bf16.mxu1 %v2144_v49  ;;  %v2185_v49 = vld [vmem:[#allocation4 + $0x230] ss:$12 sps:$4 sm:$0xff]  }
  0x95   :  { %1240 = vmatpush1.bf16.msra.mxu0 %v2103_v29  ;;  %v2165_v29 = vld [vmem:[#allocation4 + $0x1d0] ss:$12 sps:$4 sm:$0xff]  }
  0x96   :  { %1241 = vmatprep.subr.bf16.mxu0 %v2108_v31  ;;  %1889 = vmatpush3.bf16.msra.mxu1 %v2145_v51  ;;  %v2169_v31 = vld [vmem:[#allocation4 + $0x2a8] ss:$12 sps:$4 sm:$0xff]  }
  0x97   :  { %1896 = vmatprep.subr.bf16.mxu1 %v2149_v53  ;;  %v2191_v53 = vld [vmem:[#allocation4 + $0x25c] ss:$12 sps:$4 sm:$0xff]  }
  0x99   :  { %1242 = vmatpush1.bf16.msra.mxu0 %v2106_v33  ;;  %v2166_v33 = vld [vmem:[#allocation4 + $0x1e0] ss:$12 sps:$4 sm:$0xff]  }
  0x9a   :  { %1243 = vmatprep.subr.bf16.mxu0 %v2113_v34  ;;  %v2170_v34 = vld [vmem:[#allocation4 + $0x1e8] ss:$12 sps:$4 sm:$0xff]  }
  0x9d   :  { %1244 = vmatpush1.bf16.msra.mxu0 %v2111_v35  ;;  %v2173_v35 = vld [vmem:[#allocation4 + $0x1fc] ss:$12 sps:$4 sm:$0xff]  }
  0x9e   :  { %1245 = vmatprep.subr.bf16.mxu0 %v2118_v36  ;;  %v2174_v36 = vld [vmem:[#allocation4 + $0x2c0] ss:$12 sps:$4 sm:$0xff]  }
  0xa1   :  { %1246 = vmatpush1.bf16.msra.mxu0 %v2116_v37  ;;  %v149_v37 = vrot.slane %v2407_v57, %v148_v32  ;;  %v2194_v57 = vld [vmem:[#allocation4 + $0x274] ss:$12 sps:$4 sm:$0xff]  }
  0xa2   :  { %1247 = vmatprep.subr.bf16.mxu0 %v2123_v38  ;;  %v2171_v38 = vld [vmem:[#allocation4 + $0x1f8] ss:$12 sps:$4 sm:$0xff]  }
  0xa5   :  { %1248 = vmatpush1.bf16.msra.mxu0 %v2121_v39  ;;  %v2175_v39 = vld [vmem:[#allocation4 + $0x200] ss:$12 sps:$4 sm:$0xff]  }
  0xa6   :  { %1249 = vmatprep.subr.bf16.mxu0 %v2128_v40  ;;  %v2178_v40 = vld [vmem:[#allocation4 + $0x214] ss:$12 sps:$4 sm:$0xff]  }
  0xa9   :  { %1250 = vmatpush1.bf16.msra.mxu0 %v2126_v41  ;;  %v2179_v41 = vld [vmem:[#allocation4 + $0x2d8] ss:$12 sps:$4 sm:$0xff]  }
  0xaa   :  { %1251 = vmatprep.subr.bf16.mxu0 %v2133_v42 }
  0xad   :  { %1252 = vmatpush1.bf16.msra.mxu0 %v2131_v43  ;;  %v2176_v43 = vld [vmem:[#allocation4 + $0x210] ss:$12 sps:$4 sm:$0xff]  }
  0xae   :  { %1253 = vmatprep.subr.bf16.mxu0 %v2138_v44  ;;  %v2180_v44 = vld [vmem:[#allocation4 + $0x218] ss:$12 sps:$4 sm:$0xff]  }
  0xb1   :  { %1254 = vmatpush1.bf16.msra.mxu0 %v2136_v46  ;;  %v2184_v46 = vld [vmem:[#allocation4 + $0x2f0] ss:$12 sps:$4 sm:$0xff]  }
  0xb2   :  { %1255 = vmatprep.subr.bf16.mxu0 %v2143_v48  ;;  %v2181_v48 = vld [vmem:[#allocation4 + $0x228] ss:$12 sps:$4 sm:$0xff]  }
  0xb5   :  { %1256 = vmatpush1.bf16.msra.mxu0 %v2141_v50  ;;  %v2188_v50 = vld [vmem:[#allocation4 + $0x244] ss:$12 sps:$4 sm:$0xff]  }
  0xb6   :  { %1266 = vmatprep.subr.bf16.mxu0 %v2148_v52  ;;  %v2186_v52 = vld [vmem:[#allocation4 + $0x240] ss:$12 sps:$4 sm:$0xff]  }
 0x14b   :  { %v512_v61 = vpop.f32.mrb[0].mxu0 }
 0x14c   :  { %v513_v62 = vadd.f32 %v512_v61, %v141_v59  ;;  %v514_v63 = vpop.f32.mrb[1].mxu0  ;;  %v553_v17 = vpop.f32.mrb[0].mxu1  ;;  %v2192_v59 = vld [vmem:[#allocation4 + $0x270] ss:$12 sps:$4 sm:$0xff]   ;;  %v2195_v61 = vld [vmem:[#allocation4 + $0x288] ss:$12 sps:$4 sm:$0xff]  }
 0x14d   :  { %v515_v0 = vadd.f32 %v514_v63, %v145_v60  ;;  %v516_v1 = vpop.f32.mrb[2].mxu0  ;;  %v555_v18 = vpop.f32.mrb[1].mxu1  ;;  %v554_v42 = vadd.f32 %v553_v17, %v149_v37  ;;  %v2197_v60 = vld [vmem:[#allocation4 + $0x28c] ss:$12 sps:$4 sm:$0xff]  }
 0x14e   :  { %v560_v2 = vmax.f32 %v513_v62, 0.0  ;;  %v517_v3 = vpop.f32.mrb[3].mxu0  ;;  %v556_v19 = vadd.f32 %v555_v18, %v153_v12  ;;  %v557_v20 = vpop.f32.mrb[2].mxu1  ;;  %v2200_v62 = vld [vmem:[#allocation4 + $0x2a4] ss:$12 sps:$4 sm:$0xff]   ;;  %v2216_v12 = vld [vmem:[#allocation6 + $0x58] sm:$0xff]  }
 0x14f   :  { %v561_v4 = vmax.f32 %v515_v0, 0.0  ;;  %v558_v23 = vpop.f32.mrb[3].mxu1  ;;  %v562_v47 = vmax.f32 %v554_v42, 0.0  ;;  %v2198_v63 = vld [vmem:[#allocation4 + $0x2a0] ss:$12 sps:$4 sm:$0xff]   ;;  %v2222_v18 = vld [vmem:[#allocation6 + $0x70] sm:$0xff]  }
 0x150   :  { %v564_v9 = vpack.c.bf16 %v560_v2, %v560_v2  ;;  %v563_v26 = vmax.f32 %v556_v19, 0.0  ;;  %v2203_v0 = vld [vmem:[#allocation4 + $0x2bc] ss:$12 sps:$4 sm:$0xff]   ;;  %v2201_v1 = vld [vmem:[#allocation4 + $0x2b8] ss:$12 sps:$4 sm:$0xff]   ;;  %v2223_v19 = vld [vmem:[#allocation6 + $0x30] sm:$0xff]  }
 0x151   :  { %v565_v6 = vpack.c.bf16 %v561_v4, %v561_v4  ;;  %v566_v51 = vpack.c.bf16 %v562_v47, %v562_v47  ;;  %v2206_v2 = vld [vmem:[#allocation4 + $0x2d4] ss:$12 sps:$4 sm:$0xff]   ;;  %v2204_v3 = vld [vmem:[#allocation4 + $0x2d0] ss:$12 sps:$4 sm:$0xff]   ;;  %v2209_v4 = vld [vmem:[#allocation4 + $0x2ec] ss:$12 sps:$4 sm:$0xff]  }
 0x152   :  { %v567_v27 = vpack.c.bf16 %v563_v26, %v563_v26  ;;  %v2221_v17 = vld [vmem:[#allocation6 + $0x28] sm:$0xff]   ;;  %v2224_v20 = vld [vmem:[#allocation6 + $0x78] sm:$0xff]  }
 0x153   :  { %1257 = vmatprep.mubr.bf16.mxu0 %v565_v6  ;;  %1339 = vmatprep.mubr.bf16.mxu1 %v565_v6  ;;  %v2210_v6 = vld [vmem:[#allocation6 + $0x40] sm:$0xff]  }
 0x154   :  { %1258 = vmatmul.mubr.bf16.vlgmr.msra.gmra.mrb[4].mxu0 %v564_v9  ;;  %1340 = vmatmul.mubr.bf16.vlgmr.msra.gmra.mrb[4].mxu1 %v564_v9  ;;  %v2213_v9 = vld [vmem:[#allocation6 + $0x8] sm:$0xff]  }
 0x155   :  { %1267 = vmatpush1.bf16.msra.mxu0 %v2146_v7  ;;  %1897 = vmatpush3.bf16.msra.mxu1 %v2150_v8  ;;  %v2211_v7 = vld [vmem:[#allocation6] sm:$0xff]   ;;  %v2212_v8 = vld [vmem:[#allocation6 + $0x48] sm:$0xff]  }
 0x156   :  { %1268 = vmatprep.subr.bf16.mxu0 %v2153_v10  ;;  %1898 = vmatprep.subr.bf16.mxu1 %v2154_v11  ;;  %v2214_v10 = vld [vmem:[#allocation6 + $0x50] sm:$0xff]  }
 0x157   :  { %1379 = vmatprep.mubr.bf16.mxu1 %v567_v27  ;;  %1298 = vmatprep.mubr.bf16.mxu0 %v567_v27  ;;  %v2215_v11 = vld [vmem:[#allocation6 + $0x10] sm:$0xff]  }
 0x159   :  { %1269 = vmatpush1.bf16.msra.mxu0 %v2151_v13  ;;  %1899 = vmatpush3.bf16.msra.mxu1 %v2155_v14  ;;  %v2217_v13 = vld [vmem:[#allocation6 + $0x18] sm:$0xff]   ;;  %v2218_v14 = vld [vmem:[#allocation6 + $0x60] sm:$0xff]  }
 0x15a   :  { %1270 = vmatprep.subr.bf16.mxu0 %v2158_v15  ;;  %1900 = vmatprep.subr.bf16.mxu1 %v2159_v16  ;;  %v2219_v15 = vld [vmem:[#allocation6 + $0x20] sm:$0xff]   ;;  %v2220_v16 = vld [vmem:[#allocation6 + $0x68] sm:$0xff]  }
 0x15d   :  { %1271 = vmatpush1.bf16.msra.mxu0 %v2156_v21  ;;  %1901 = vmatpush3.bf16.msra.mxu1 %v2160_v22  ;;  %v2225_v21 = vld [vmem:[#allocation6 + $0x38] sm:$0xff]   ;;  %v2317_v22 = vmov 0.0  }
 0x15e   :  { %1272 = vmatprep.subr.bf16.mxu0 %v2163_v24  ;;  %1902 = vmatprep.subr.bf16.mxu1 %v2164_v25 }
 0x161   :  { %1273 = vmatpush1.bf16.msra.mxu0 %v2161_v28  ;;  %1903 = vmatpush3.bf16.msra.mxu1 %v2165_v29  ;;  %v696_v28 = vld [vmem:[%s2441_s4] sm:$0x7] }
 0x162   :  { %1274 = vmatprep.subr.bf16.mxu0 %v2168_v30  ;;  %1904 = vmatprep.subr.bf16.mxu1 %v2169_v31  ;;  %v709_v29 = vrot.slane %v696_v28, %v148_v32 }
 0x165   :  { %1275 = vmatpush1.bf16.msra.mxu0 %v2166_v33  ;;  %1905 = vmatpush3.bf16.msra.mxu1 %v2170_v34 }
 0x166   :  { %1276 = vmatprep.subr.bf16.mxu0 %v2173_v35  ;;  %1906 = vmatprep.subr.bf16.mxu1 %v2174_v36 }
 0x169   :  { %1277 = vmatpush1.bf16.msra.mxu0 %v2171_v38  ;;  %1907 = vmatpush3.bf16.msra.mxu1 %v2175_v39  ;;  %v701_v38 = vrot.slane %v696_v28, %v140_v56  ;;  %v705_v39 = vrot.slane %v696_v28, %v144_v58  ;;  %v2229_v56 = vld [vmem:[#allocation6 + $0x98] sm:$0xff]   ;;  %v2230_v58 = vld [vmem:[#allocation6 + $0xa0] sm:$0xff]  }
 0x16a   :  { %1278 = vmatprep.subr.bf16.mxu0 %v2178_v40  ;;  %1908 = vmatprep.subr.bf16.mxu1 %v2179_v41 }
 0x16d   :  { %1279 = vmatpush1.bf16.msra.mxu0 %v2176_v43  ;;  %1909 = vmatpush3.bf16.msra.mxu1 %v2180_v44 }
 0x16e   :  { %1280 = vmatprep.subr.bf16.mxu0 %v2183_v45  ;;  %1910 = vmatprep.subr.bf16.mxu1 %v2184_v46 }
 0x171   :  { %1281 = vmatpush1.bf16.msra.mxu0 %v2181_v48  ;;  %1911 = vmatpush3.bf16.msra.mxu1 %v2185_v49  ;;  %v2226_v48 = vld [vmem:[#allocation6 + $0x80] sm:$0xff]  }
 0x172   :  { %1282 = vmatprep.subr.bf16.mxu0 %v2188_v50  ;;  %1918 = vmatprep.subr.bf16.mxu1 %v2210_v6  ;;  %v2227_v50 = vld [vmem:[#allocation6 + $0x88] sm:$0xff]  }
 0x174   :  { %1380 = vmatmul.mubr.bf16.vlgmr.msra.gmra.mrb[8].mxu1 %v566_v51 }
 0x175   :  { %1283 = vmatpush1.bf16.msra.mxu0 %v2186_v52  ;;  %1919 = vmatpush3.bf16.msra.mxu1 %v2211_v7  ;;  %v2232_v52 = vld [vmem:[#allocation6 + $0xb0] sm:$0xff]  }
 0x176   :  { %1284 = vmatprep.subr.bf16.mxu0 %v2191_v53  ;;  %1920 = vmatprep.subr.bf16.mxu1 %v2212_v8  ;;  %v2233_v53 = vld [vmem:[#allocation6 + $0xb8] sm:$0xff]  }
 0x179   :  { %1285 = vmatpush1.bf16.msra.mxu0 %v2189_v54  ;;  %1921 = vmatpush3.bf16.msra.mxu1 %v2213_v9 }
 0x17a   :  { %1286 = vmatprep.subr.bf16.mxu0 %v2194_v57  ;;  %1922 = vmatprep.subr.bf16.mxu1 %v2214_v10 }
 0x17d   :  { %1287 = vmatpush1.bf16.msra.mxu0 %v2192_v59  ;;  %1923 = vmatpush3.bf16.msra.mxu1 %v2215_v11 }
 0x17e   :  { %1288 = vmatprep.subr.bf16.mxu0 %v2197_v60  ;;  %1924 = vmatprep.subr.bf16.mxu1 %v2216_v12 }
 0x181   :  { %1289 = vmatpush1.bf16.msra.mxu0 %v2195_v61  ;;  %1925 = vmatpush3.bf16.msra.mxu1 %v2217_v13 }
 0x182   :  { %1290 = vmatprep.subr.bf16.mxu0 %v2200_v62  ;;  %1926 = vmatprep.subr.bf16.mxu1 %v2218_v14 }
 0x185   :  { %1291 = vmatpush1.bf16.msra.mxu0 %v2198_v63  ;;  %1927 = vmatpush3.bf16.msra.mxu1 %v2219_v15 }
 0x186   :  { %1292 = vmatprep.subr.bf16.mxu0 %v2203_v0  ;;  %1928 = vmatprep.subr.bf16.mxu1 %v2220_v16  ;;  %v1849_v0 = vld [vmem:[%s2443_s6] ss:$0 sm:$0xff] }
 0x189   :  { %1293 = vmatpush1.bf16.msra.mxu0 %v2201_v1  ;;  %1929 = vmatpush3.bf16.msra.mxu1 %v2221_v17 }
 0x18a   :  { %1294 = vmatprep.subr.bf16.mxu0 %v2206_v2  ;;  %1930 = vmatprep.subr.bf16.mxu1 %v2222_v18 }
 0x18d   :  { %1295 = vmatpush1.bf16.msra.mxu0 %v2204_v3  ;;  %1931 = vmatpush3.bf16.msra.mxu1 %v2223_v19 }
 0x18e   :  { %1296 = vmatprep.subr.bf16.mxu0 %v2209_v4  ;;  %1932 = vmatprep.subr.bf16.mxu1 %v2224_v20 }
 0x191   :  { %1297 = vmatpush1.bf16.msra.mxu0 %v2207_v5  ;;  %1933 = vmatpush3.bf16.msra.mxu1 %v2225_v21 }
 0x192   :  { %1949 = vmatprep.subr.bf16.mxu1 %v2317_v22 }
 0x194   :  { %1299 = vmatmul.mubr.bf16.vlgmr.msra.gmra.mrb[4].mxu0 %v566_v51  ;;  %v2231_v51 = vld [vmem:[#allocation6 + $0xa8] sm:$0xff]  }
 0x227   :  { %v1890_v23 = vpop.f32.mrb[4].mxu1 }
 0x228   :  { %v1891_v24 = vpop.f32.mrb[5].mxu1 }
 0x229   :  { %v1892_v25 = vadd.f32 %v1891_v24, %v1890_v23  ;;  %v1893_v26 = vpop.f32.mrb[6].mxu1 }
 0x22a   :  { %v1894_v27 = vpop.f32.mrb[7].mxu1 }
 0x22b   :  { %v1342_v33 = vadd.f32 %v1892_v25, %v709_v29 }
 0x247   :  { %v1912_v30 = vpop.f32.mrb[8].mxu1 }
 0x248   :  { %v1913_v31 = vpop.f32.mrb[9].mxu1 }
 0x249   :  { %v1914_v34 = vadd.f32 %v1913_v31, %v1912_v30  ;;  %v1915_v35 = vpop.f32.mrb[10].mxu1 }
 0x24a   :  { %v1916_v36 = vpop.f32.mrb[11].mxu1 }
 0x24b   :  { %v1382_v37 = vadd.f32 %v1914_v34, %v1342_v33 }
 0x24d   :  { %v1389_v54 = vmax.f32 %v1382_v37, 0.0 }
 0x24f   :  { %v1392_v57 = vpack.c.bf16 %v1389_v54, %v1389_v54 }
 0x267   :  { %v1300_v40 = vpop.f32.mrb[4].mxu0 }
 0x268   :  { %v1969_v41 = vadd.f32 %v1300_v40, %v701_v38  ;;  %v1302_v42 = vpop.f32.mrb[5].mxu0 }
 0x269   :  { %v1970_v43 = vadd.f32 %v1302_v42, %v705_v39  ;;  %v1304_v44 = vpop.f32.mrb[6].mxu0 }
 0x26a   :  { %v1387_v45 = vmax.f32 %v1969_v41, 0.0  ;;  %v1305_v32 = vpop.f32.mrb[7].mxu0 }
 0x26b   :  { %v1388_v46 = vmax.f32 %v1970_v43, 0.0 }
 0x26c   :  { %v1390_v49 = vpack.c.bf16 %v1387_v45, %v1387_v45 }
 0x26d   :  { %v1391_v47 = vpack.c.bf16 %v1388_v46, %v1388_v46 }
 0x26f   :  { %1624 = vmatprep.mubr.bf16.mxu1 %v1391_v47 }
 0x270   :  { %1625 = vmatmul.mubr.bf16.vlgmr.msra.gmra.mrb[12].mxu1 %v1390_v49 }
 0x271   :  { %1950 = vmatpush3.bf16.msra.mxu1 %v2226_v48  ;;  %1965 = vmatprep.mubr.msk.bf16.mxu1 %vm2318_vm0, %v2317_v22 }
 0x272   :  { %1951 = vmatprep.subr.bf16.mxu1 %v2317_v22 }
 0x275   :  { %1952 = vmatpush3.bf16.msra.mxu1 %v2227_v50 }
 0x276   :  { %1953 = vmatprep.subr.bf16.mxu1 %v2317_v22 }
 0x279   :  { %1954 = vmatpush3.bf16.msra.mxu1 %v2228_v55 }
 0x27a   :  { %1955 = vmatprep.subr.bf16.mxu1 %v2317_v22 }
 0x27d   :  { %1956 = vmatpush3.bf16.msra.mxu1 %v2229_v56 }
 0x27e   :  { %1957 = vmatprep.subr.bf16.mxu1 %v2317_v22 }
 0x281   :  { %1958 = vmatpush3.bf16.msra.mxu1 %v2230_v58 }
 0x282   :  { %1959 = vmatprep.subr.bf16.mxu1 %v2317_v22 }
 0x285   :  { %1960 = vmatpush3.bf16.msra.mxu1 %v2231_v51 }
 0x286   :  { %1961 = vmatprep.subr.bf16.mxu1 %v2317_v22 }
 0x289   :  { %1962 = vmatpush3.bf16.msra.mxu1 %v2232_v52 }
 0x28a   :  { %1963 = vmatprep.subr.bf16.mxu1 %v2317_v22 }
 0x28d   :  { %1964 = vmatpush3.bf16.msra.mxu1 %v2233_v53 }
 0x290   :  { %1966 = vmatmul.mubr.bf16.vlgmr.msra.gmra.mrb[16].mxu1 %v1392_v57 }
 0x343   :  { %v1934_v59 = vpop.f32.mrb[12].mxu1 }
 0x344   :  { %v1935_v60 = vpop.f32.mrb[13].mxu1 }
 0x345   :  { %v1936_v61 = vadd.f32 %v1935_v60, %v1934_v59  ;;  %v1937_v62 = vpop.f32.mrb[14].mxu1 }
 0x346   :  { %v1938_v63 = vpop.f32.mrb[15].mxu1 }
 0x347   :  { %v1627_v1 = vadd.f32 %v1936_v61, %v1849_v0 }
 0x363   :  { %v1666_v2 = vpop.f32.mrb[16].mxu1 }
 0x364   :  { %v1667_v3 = vadd.f32 %v1666_v2, %v1627_v1  ;;  %v1967_v4 = vpop.f32.mrb[17].mxu1 }
 0x365   :  { %v1669_v5 = vpop.f32.mrb[18].mxu1 }
 0x366   :  { %v1968_v6 = vpop.f32.mrb[19].mxu1  ;;  %1672 = vmax.xlane.f32.xlu0 %v1667_v3 }
 0x3f3   :  { %v1673_v7 = vpop.xlane.xlu0 %1672 }
 0x3f4   :  { %v1674_v8 = vsub.f32 %v1667_v3, %v1673_v7 }
 0x3f6   :  { %v1675_v9 = vmul.f32 1.442695, %v1674_v8 }
 0x3f8   :  { %2234 = vpow2.f32 %v1675_v9 }
 0x402   :  { %v2235_v10 = vpop.eup %2234 }
 0x403   :  { %1677 = vadd.xlane.f32.xlu0 %v2235_v10 }
 0x490   :  { %v1678_v11 = vpop.xlane.xlu0 %1677 }
 0x491   :  { %2236 = vrcp.f32 %v1678_v11 }
 0x49b   :  { %v2237_v12 = vpop.eup %2236 }
 0x49c   :  { %v1680_v13 = vmul.f32 %v2237_v12, %v2235_v10 }
 0x49e   :  { %v1681_v14 = vpack.c.bf16 %v1680_v13, %v1680_v13 }
 0x4a0   :  { %1682 = vst [vmem:[%s2444_s7] sm:$0xf] %v1681_v14 }
 0x4a1   :  { %1687 = vsyncpa [#allocation3], 1 }
 0x4a2   :  { %1688 = vsyncpa [#allocation5], 1 }

</bundles_post_ra>
